<compile_context>
chip_gen: v6e
topology: v6e:2x2x1
jax: 0.10.0
libtpu: 0.0.40
codegen_flags: <defaults>
</compile_context>

<pallas_src>
import functools

import jax
import jax.numpy as jnp
from jax import lax
from jax.experimental import pallas as pl
from jax.experimental.pallas import tpu as pltpu

LANE = 128
MAX_TILE_ROWS = 2048     # VMEM safety cap (see header comment)


def _round_up(x, m):
    return (x + m - 1) // m * m


def _sublane_multiple(dtype):
    # Native sublane tiling: f32 -> 8, bf16/f16 -> 16, int8/bool/fp8 -> 32.
    return max(8, 32 // max(1, jnp.dtype(dtype).itemsize))


def _masked_l2_kernel(out_ref, tgt_ref, mask_ref, sums_ref, *accs,
                      tiles_per_core, num_tiles, tile_rows, rows_in_last,
                      regularize, guard_oob):
    """Grid = (cores ["parallel"], row-tiles per core ["arbitrary"]).

    Each core streams its contiguous chunk of row tiles, keeps four single-vreg
    (8, 128) f32 accumulators in VMEM scratch, and writes its raw partial sums
    [sum sq|mask!=0, count mask!=0, sum sq|mask!=1, count mask!=1] to SMEM row c.
    """
    acc_sqm0, acc_cnt0 = accs[0], accs[1]
    acc_sqm1 = accs[2] if regularize else None
    acc_cnt1 = accs[3] if regularize else None

    c = pl.program_id(0)            # TensorCore shard
    i = pl.program_id(1)            # row-tile step within this shard
    g = c * tiles_per_core + i      # global row-tile index

    @pl.when(i == 0)
    def _init():
        acc_sqm0[...] = jnp.zeros_like(acc_sqm0)
        acc_cnt0[...] = jnp.zeros_like(acc_cnt0)
        if regularize:
            acc_sqm1[...] = jnp.zeros_like(acc_sqm1)
            acc_cnt1[...] = jnp.zeros_like(acc_cnt1)

    def _fold(x):
        # (tile_rows, LANE) -> (8, LANE): the reshape is a pure relabeling of
        # sublane-tiled vregs (tile_rows % 8 == 0), so the reduce over axis 0 is
        # a tree of whole-vreg VALU adds — no XLU, no extra VMEM traffic.
        return jnp.sum(x.reshape(tile_rows // 8, 8, LANE), axis=0)

    def _accumulate(valid=None):
        o = out_ref[...].astype(jnp.float32)
        t = tgt_ref[...].astype(jnp.float32)
        mv = mask_ref[...]
        m0 = mv != 0                      # torch: mask.type(torch.bool)
        if regularize:
            m1 = mv != 1                  # torch: (1 - mask).type(torch.bool)
        if valid is not None:
            # AND the in-bounds mask in; the selects below guarantee that stale
            # NaN/Inf DMA garbage past the end can never be selected into a sum.
            m0 = jnp.logical_and(m0, valid)
            if regularize:
                m1 = jnp.logical_and(m1, valid)
        diff = o - t
        sq = diff * diff
        acc_sqm0[...] += _fold(jnp.where(m0, sq, 0.0))
        acc_cnt0[...] += _fold(jnp.where(m0, 1.0, 0.0))
        if regularize:
            acc_sqm1[...] += _fold(jnp.where(m1, sq, 0.0))
            acc_cnt1[...] += _fold(jnp.where(m1, 1.0, 0.0))

    if rows_in_last == tile_rows:
        # No ragged tile: steady state is completely unmasked.
        if guard_oob:
            @pl.when(g < num_tiles)       # skip the shorter core's padded steps
            def _steady():
                _accumulate()
        else:
            _accumulate()
    else:
        # Ragged last tile: keep the steady state clean, mask only the last tile.
        @pl.when(g < num_tiles - 1)
        def _steady():
            _accumulate()

        @pl.when(g == num_tiles - 1)
        def _last():
            row = lax.broadcasted_iota(jnp.int32, (tile_rows, LANE), 0)
            _accumulate(valid=row < rows_in_last)

    @pl.when(i == tiles_per_core - 1)
    def _finalize():
        sums_ref[0, 0] = jnp.sum(acc_sqm0[...])
        sums_ref[0, 1] = jnp.sum(acc_cnt0[...])
        if regularize:
            sums_ref[0, 2] = jnp.sum(acc_sqm1[...])
            sums_ref[0, 3] = jnp.sum(acc_cnt1[...])
        else:
            sums_ref[0, 2] = jnp.float32(0.0)
            sums_ref[0, 3] = jnp.float32(0.0)


def masked_l2_loss(output, target, mask, *, regularize=True, regcoeff=1.0,
                   tile_rows=1024, num_cores=2):
    if mask.dtype == jnp.bool_:
        mask = mask.astype(jnp.int8)      # avoid i1 tensors in the kernel

    out_f = output.reshape(-1)
    tgt_f = target.reshape(-1)
    msk_f = mask.reshape(-1)
    n = out_f.shape[0]

    rows = n // LANE                      # full 128-wide rows handled by the kernel
    n_main = rows * LANE

    # [sum sq | mask!=0, count mask!=0, sum sq | mask!=1, count mask!=1]
    sums = jnp.zeros((4,), jnp.float32)

    if rows > 0:
        if n_main == n:                   # aligned: pure bitcast reshape, no copy
            out2d = out_f.reshape(rows, LANE)
            tgt2d = tgt_f.reshape(rows, LANE)
            msk2d = msk_f.reshape(rows, LANE)
        else:                             # unaligned: kernel gets the aligned prefix
            out2d = out_f[:n_main].reshape(rows, LANE)
            tgt2d = tgt_f[:n_main].reshape(rows, LANE)
            msk2d = msk_f[:n_main].reshape(rows, LANE)

        sub = max(_sublane_multiple(out2d.dtype),
                  _sublane_multiple(tgt2d.dtype),
                  _sublane_multiple(msk2d.dtype))
        tr = _round_up(min(int(tile_rows), rows, MAX_TILE_ROWS), sub)

        num_tiles = pl.cdiv(rows, tr)
        ncores = max(1, min(int(num_cores), num_tiles))
        tiles_per_core = pl.cdiv(num_tiles, ncores)
        guard_oob = ncores * tiles_per_core > num_tiles
        rows_in_last = rows - (num_tiles - 1) * tr

        if guard_oob:
            last_block = num_tiles - 1

            def in_map(c, i):
                # Clamp the shorter core's padded steps onto the last tile; the
                # kernel skips their accumulation via the `g < num_tiles` guard.
                return (jnp.minimum(c * tiles_per_core + i, last_block), 0)
        else:
            def in_map(c, i):
                return (c * tiles_per_core + i, 0)

        kernel = functools.partial(
            _masked_l2_kernel,
            tiles_per_core=tiles_per_core,
            num_tiles=num_tiles,
            tile_rows=tr,
            rows_in_last=rows_in_last,
            regularize=bool(regularize),
            guard_oob=guard_oob,
        )

        n_acc = 4 if regularize else 2
        scratch = [pltpu.VMEM((8, LANE), jnp.float32) for _ in range(n_acc)]

        per_core = pl.pallas_call(
            kernel,
            out_shape=jax.ShapeDtypeStruct((ncores, 4), jnp.float32),
            grid_spec=pltpu.PrefetchScalarGridSpec(
                num_scalar_prefetch=0,
                grid=(ncores, tiles_per_core),
                in_specs=[
                    pl.BlockSpec((tr, LANE), in_map),
                    pl.BlockSpec((tr, LANE), in_map),
                    pl.BlockSpec((tr, LANE), in_map),
                ],
                out_specs=pl.BlockSpec((1, 4), lambda c, i: (c, 0),
                                       memory_space=pltpu.MemorySpace.SMEM),
                scratch_shapes=scratch,
            ),
            compiler_params=pltpu.CompilerParams(
                dimension_semantics=("parallel", "arbitrary")),
        )(out2d, tgt2d, msk2d)
        sums = sums + jnp.sum(per_core, axis=0)

    if n_main < n:
        # <128-element tail folded in with a tiny jnp reduction (no pad, no extra
        # HBM round trip of the full tensors).
        ot = out_f[n_main:].astype(jnp.float32)
        tt = tgt_f[n_main:].astype(jnp.float32)
        mt = msk_f[n_main:]
        sqt = (ot - tt) * (ot - tt)
        m0 = mt != 0
        m1 = mt != 1
        sums = sums + jnp.stack([
            jnp.sum(jnp.where(m0, sqt, 0.0)),
            jnp.sum(m0.astype(jnp.float32)),
            jnp.sum(jnp.where(m1, sqt, 0.0)),
            jnp.sum(m1.astype(jnp.float32)),
        ])

    loss = sums[0] / sums[1]
    if regularize:
        loss = loss + jnp.float32(regcoeff) * (sums[2] / sums[3])
    return loss


def _reference_loss(output, target, mask, *, regularize=True, regcoeff=1.0):
    o = output.astype(jnp.float32)
    t = target.astype(jnp.float32)
    sq = (o - t) ** 2
    m0 = mask != 0                        # mask.bool()
    loss = jnp.sum(jnp.where(m0, sq, 0.0)) / jnp.sum(m0.astype(jnp.float32))
    if regularize:
        m1 = mask != 1                    # (1 - mask).bool()
        loss = loss + regcoeff * (jnp.sum(jnp.where(m1, sq, 0.0))
                                  / jnp.sum(m1.astype(jnp.float32)))
    return loss


if __name__ == "__main__":
    key = jax.random.PRNGKey(0)
    ks = jax.random.split(key, 12)

    # Case 1: module-default config on a small NCHW-like tensor (aligned size).
    shape1 = (2, 4, 16, 16)
    out1 = jax.random.normal(ks[0], shape1, dtype=jnp.float32)
    tgt1 = jax.random.normal(ks[1], shape1, dtype=jnp.float32)
    msk1 = jax.random.bernoulli(ks[2], p=0.5, shape=shape1).astype(jnp.float32)
    loss1 = jax.block_until_ready(masked_l2_loss(out1, tgt1, msk1))
    ref1 = _reference_loss(out1, tgt1, msk1)
    assert jnp.allclose(loss1, ref1, rtol=1e-5, atol=1e-6), (loss1, ref1)

    # Case 2: bf16 values, 2-way core split, ragged last row-tile inside the kernel.
    shape2 = (3, 5, 16, 16)               # 3840 elements = 30 rows of 128
    out2 = jax.random.normal(ks[3], shape2, dtype=jnp.bfloat16)
    tgt2 = jax.random.normal(ks[4], shape2, dtype=jnp.bfloat16)
    msk2 = jax.random.bernoulli(ks[5], p=0.3, shape=shape2).astype(jnp.float32)
    loss2 = jax.block_until_ready(masked_l2_loss(out2, tgt2, msk2, tile_rows=8))
    ref2 = _reference_loss(out2, tgt2, msk2)
    assert jnp.allclose(loss2, ref2, rtol=1e-5, atol=1e-6), (loss2, ref2)

    # Case 3: unaligned flat size (JAX tail path) + regularize=False (2 accumulators).
    n3 = 1080                             # 8 full rows + 56-element tail
    out3 = jax.random.normal(ks[6], (n3,), dtype=jnp.float32)
    tgt3 = jax.random.normal(ks[7], (n3,), dtype=jnp.float32)
    msk3 = jax.random.bernoulli(ks[8], p=0.5, shape=(n3,)).astype(jnp.float32)
    loss3 = jax.block_until_ready(masked_l2_loss(out3, tgt3, msk3, regularize=False))
    ref3 = _reference_loss(out3, tgt3, msk3, regularize=False)
    assert jnp.allclose(loss3, ref3, rtol=1e-5, atol=1e-6), (loss3, ref3)

    # Case 4: odd tile count -> uneven 2-core split (clamped index_map + OOB guard).
    shape4 = (40, 128)
    out4 = jax.random.normal(ks[9], shape4, dtype=jnp.float32)
    tgt4 = jax.random.normal(ks[10], shape4, dtype=jnp.float32)
    msk4 = jax.random.bernoulli(ks[11], p=0.5, shape=shape4).astype(jnp.float32)
    loss4 = jax.block_until_ready(masked_l2_loss(out4, tgt4, msk4, tile_rows=8))
    ref4 = _reference_loss(out4, tgt4, msk4)
    assert jnp.allclose(loss4, ref4, rtol=1e-5, atol=1e-6), (loss4, ref4)

    print("KERNEL_OK")
</pallas_src>

<mosaic_0001>
module attributes {stable_mosaic.version = 11 : i64} {
  func.func @_masked_l2_kernel(%arg0: i32, %arg1: i32, %arg2: memref<16x128xf32, #tpu.memory_space<vmem>>, %arg3: memref<16x128xf32, #tpu.memory_space<vmem>>, %arg4: memref<16x128xf32, #tpu.memory_space<vmem>>, %arg5: memref<1x4xf32, #tpu.memory_space<smem>>, %arg6: memref<8x128xf32, #tpu.memory_space<vmem>>, %arg7: memref<8x128xf32, #tpu.memory_space<vmem>>, %arg8: memref<8x128xf32, #tpu.memory_space<vmem>>, %arg9: memref<8x128xf32, #tpu.memory_space<vmem>>) attributes {dimension_semantics = [#tpu.dimension_semantics<parallel>, #tpu.dimension_semantics<arbitrary>], iteration_bounds = array<i64: 1, 1>, scalar_prefetch = 0 : i64, scratch_operands = 4 : i64, tpu.core_type = #tpu.core_type<tc>, window_params = [{transform_indices = @transform_0, window_bounds = array<i64: 16, 128>}, {transform_indices = @transform_1, window_bounds = array<i64: 16, 128>}, {transform_indices = @transform_2, window_bounds = array<i64: 16, 128>}, {transform_indices = @transform_3, window_bounds = array<i64: 1, 4>}]} {
    %c0_i32 = arith.constant 0 : i32
    %0 = arith.cmpi eq, %arg1, %c0_i32 : i32
    %1 = arith.extui %0 : i1 to i32
    %c0_i32_0 = arith.constant 0 : i32
    %2 = arith.cmpi ne, %1, %c0_i32_0 : i32
    scf.if %2 {
      %cst_35 = arith.constant 0.000000e+00 : f32
      %45 = vector.broadcast %cst_35 : f32 to vector<8x128xf32>
      %c0_36 = arith.constant 0 : index
      %c0_37 = arith.constant 0 : index
      %46 = vector.load %arg6[%c0_36, %c0_37] : memref<8x128xf32, #tpu.memory_space<vmem>>, vector<8x128xf32>
      tpu.vector_store %arg6[%c0_36, %c0_37], %45 {strides = array<i32>} : memref<8x128xf32, #tpu.memory_space<vmem>>, vector<8x128xf32>,
      %cst_38 = arith.constant 0.000000e+00 : f32
      %47 = vector.broadcast %cst_38 : f32 to vector<8x128xf32>
      %c0_39 = arith.constant 0 : index
      %c0_40 = arith.constant 0 : index
      %48 = vector.load %arg7[%c0_39, %c0_40] : memref<8x128xf32, #tpu.memory_space<vmem>>, vector<8x128xf32>
      tpu.vector_store %arg7[%c0_39, %c0_40], %47 {strides = array<i32>} : memref<8x128xf32, #tpu.memory_space<vmem>>, vector<8x128xf32>,
      %cst_41 = arith.constant 0.000000e+00 : f32
      %49 = vector.broadcast %cst_41 : f32 to vector<8x128xf32>
      %c0_42 = arith.constant 0 : index
      %c0_43 = arith.constant 0 : index
      %50 = vector.load %arg8[%c0_42, %c0_43] : memref<8x128xf32, #tpu.memory_space<vmem>>, vector<8x128xf32>
      tpu.vector_store %arg8[%c0_42, %c0_43], %49 {strides = array<i32>} : memref<8x128xf32, #tpu.memory_space<vmem>>, vector<8x128xf32>,
      %cst_44 = arith.constant 0.000000e+00 : f32
      %51 = vector.broadcast %cst_44 : f32 to vector<8x128xf32>
      %c0_45 = arith.constant 0 : index
      %c0_46 = arith.constant 0 : index
      %52 = vector.load %arg9[%c0_45, %c0_46] : memref<8x128xf32, #tpu.memory_space<vmem>>, vector<8x128xf32>
      tpu.vector_store %arg9[%c0_45, %c0_46], %51 {strides = array<i32>} : memref<8x128xf32, #tpu.memory_space<vmem>>, vector<8x128xf32>,
    } else {
    }
    %c0 = arith.constant 0 : index
    %c0_1 = arith.constant 0 : index
    %3 = vector.load %arg2[%c0, %c0_1] : memref<16x128xf32, #tpu.memory_space<vmem>>, vector<16x128xf32>
    %c0_2 = arith.constant 0 : index
    %c0_3 = arith.constant 0 : index
    %4 = vector.load %arg3[%c0_2, %c0_3] : memref<16x128xf32, #tpu.memory_space<vmem>>, vector<16x128xf32>
    %c0_4 = arith.constant 0 : index
    %c0_5 = arith.constant 0 : index
    %5 = vector.load %arg4[%c0_4, %c0_5] : memref<16x128xf32, #tpu.memory_space<vmem>>, vector<16x128xf32>
    %cst = arith.constant 0.000000e+00 : f32
    %6 = vector.broadcast %cst : f32 to vector<16x128xf32>
    %7 = arith.cmpf one, %5, %6 : vector<16x128xf32>
    %cst_6 = arith.constant 1.000000e+00 : f32
    %8 = vector.broadcast %cst_6 : f32 to vector<16x128xf32>
    %9 = arith.cmpf one, %5, %8 : vector<16x128xf32>
    %10 = arith.subf %3, %4 : vector<16x128xf32>
    %11 = arith.mulf %10, %10 : vector<16x128xf32>
    %c0_7 = arith.constant 0 : index
    %c0_8 = arith.constant 0 : index
    %12 = vector.load %arg6[%c0_7, %c0_8] : memref<8x128xf32, #tpu.memory_space<vmem>>, vector<8x128xf32>
    %cst_9 = arith.constant 0.000000e+00 : f32
    %13 = vector.broadcast %cst_9 : f32 to vector<16x128xf32>
    %14 = arith.select %7, %11, %13 : vector<16x128xi1>, vector<16x128xf32>
    %15 = vector.shape_cast %14 : vector<16x128xf32> to vector<2x8x128xf32>
    %cst_10 = arith.constant dense<0.000000e+00> : vector<8x128xf32>
    %16 = vector.multi_reduction <add>, %15, %cst_10 [0] : vector<2x8x128xf32> to vector<8x128xf32>
    %17 = arith.addf %12, %16 : vector<8x128xf32>
    %c0_11 = arith.constant 0 : index
    %c0_12 = arith.constant 0 : index
    %18 = vector.load %arg6[%c0_11, %c0_12] : memref<8x128xf32, #tpu.memory_space<vmem>>, vector<8x128xf32>
    tpu.vector_store %arg6[%c0_11, %c0_12], %17 {strides = array<i32>} : memref<8x128xf32, #tpu.memory_space<vmem>>, vector<8x128xf32>,
    %c0_13 = arith.constant 0 : index
    %c0_14 = arith.constant 0 : index
    %19 = vector.load %arg7[%c0_13, %c0_14] : memref<8x128xf32, #tpu.memory_space<vmem>>, vector<8x128xf32>
    %cst_15 = arith.constant 1.000000e+00 : f32
    %cst_16 = arith.constant 0.000000e+00 : f32
    %20 = vector.broadcast %cst_15 : f32 to vector<16x128xf32>
    %21 = vector.broadcast %cst_16 : f32 to vector<16x128xf32>
    %22 = arith.select %7, %20, %21 : vector<16x128xi1>, vector<16x128xf32>
    %23 = vector.shape_cast %22 : vector<16x128xf32> to vector<2x8x128xf32>
    %cst_17 = arith.constant dense<0.000000e+00> : vector<8x128xf32>
    %24 = vector.multi_reduction <add>, %23, %cst_17 [0] : vector<2x8x128xf32> to vector<8x128xf32>
    %25 = arith.addf %19, %24 : vector<8x128xf32>
    %c0_18 = arith.constant 0 : index
    %c0_19 = arith.constant 0 : index
    %26 = vector.load %arg7[%c0_18, %c0_19] : memref<8x128xf32, #tpu.memory_space<vmem>>, vector<8x128xf32>
    tpu.vector_store %arg7[%c0_18, %c0_19], %25 {strides = array<i32>} : memref<8x128xf32, #tpu.memory_space<vmem>>, vector<8x128xf32>,
    %c0_20 = arith.constant 0 : index
    %c0_21 = arith.constant 0 : index
    %27 = vector.load %arg8[%c0_20, %c0_21] : memref<8x128xf32, #tpu.memory_space<vmem>>, vector<8x128xf32>
    %cst_22 = arith.constant 0.000000e+00 : f32
    %28 = vector.broadcast %cst_22 : f32 to vector<16x128xf32>
    %29 = arith.select %9, %11, %28 : vector<16x128xi1>, vector<16x128xf32>
    %30 = vector.shape_cast %29 : vector<16x128xf32> to vector<2x8x128xf32>
    %cst_23 = arith.constant dense<0.000000e+00> : vector<8x128xf32>
    %31 = vector.multi_reduction <add>, %30, %cst_23 [0] : vector<2x8x128xf32> to vector<8x128xf32>
    %32 = arith.addf %27, %31 : vector<8x128xf32>
    %c0_24 = arith.constant 0 : index
    %c0_25 = arith.constant 0 : index
    %33 = vector.load %arg8[%c0_24, %c0_25] : memref<8x128xf32, #tpu.memory_space<vmem>>, vector<8x128xf32>
    tpu.vector_store %arg8[%c0_24, %c0_25], %32 {strides = array<i32>} : memref<8x128xf32, #tpu.memory_space<vmem>>, vector<8x128xf32>,
    %c0_26 = arith.constant 0 : index
    %c0_27 = arith.constant 0 : index
    %34 = vector.load %arg9[%c0_26, %c0_27] : memref<8x128xf32, #tpu.memory_space<vmem>>, vector<8x128xf32>
    %cst_28 = arith.constant 1.000000e+00 : f32
    %cst_29 = arith.constant 0.000000e+00 : f32
    %35 = vector.broadcast %cst_28 : f32 to vector<16x128xf32>
    %36 = vector.broadcast %cst_29 : f32 to vector<16x128xf32>
    %37 = arith.select %9, %35, %36 : vector<16x128xi1>, vector<16x128xf32>
    %38 = vector.shape_cast %37 : vector<16x128xf32> to vector<2x8x128xf32>
    %cst_30 = arith.constant dense<0.000000e+00> : vector<8x128xf32>
    %39 = vector.multi_reduction <add>, %38, %cst_30 [0] : vector<2x8x128xf32> to vector<8x128xf32>
    %40 = arith.addf %34, %39 : vector<8x128xf32>
    %c0_31 = arith.constant 0 : index
    %c0_32 = arith.constant 0 : index
    %41 = vector.load %arg9[%c0_31, %c0_32] : memref<8x128xf32, #tpu.memory_space<vmem>>, vector<8x128xf32>
    tpu.vector_store %arg9[%c0_31, %c0_32], %40 {strides = array<i32>} : memref<8x128xf32, #tpu.memory_space<vmem>>, vector<8x128xf32>,
    %c0_i32_33 = arith.constant 0 : i32
    %42 = arith.cmpi eq, %arg1, %c0_i32_33 : i32
    %43 = arith.extui %42 : i1 to i32
    %c0_i32_34 = arith.constant 0 : i32
    %44 = arith.cmpi ne, %43, %c0_i32_34 : i32
    scf.if %44 {
      %c0_35 = arith.constant 0 : index
      %c0_36 = arith.constant 0 : index
      %45 = vector.load %arg6[%c0_35, %c0_36] : memref<8x128xf32, #tpu.memory_space<vmem>>, vector<8x128xf32>
      %46 = vector.shape_cast %45 : vector<8x128xf32> to vector<1x8x128xf32>
      %cst_37 = arith.constant dense<0.000000e+00> : vector<1xf32>
      %47 = vector.multi_reduction <add>, %46, %cst_37 [1, 2] : vector<1x8x128xf32> to vector<1xf32>
      %48 = vector.shape_cast %47 : vector<1xf32> to vector<1x1x1xf32>
      %49 = vector.extract %48[0, 0, 0] : f32 from vector<1x1x1xf32>
      %c0_38 = arith.constant 0 : index
      %c0_39 = arith.constant 0 : index
      %50 = memref.load %arg5[%c0_38, %c0_39] : memref<1x4xf32, #tpu.memory_space<smem>>
      memref.store %49, %arg5[%c0_38, %c0_39] : memref<1x4xf32, #tpu.memory_space<smem>>
      %c0_40 = arith.constant 0 : index
      %c0_41 = arith.constant 0 : index
      %51 = vector.load %arg7[%c0_40, %c0_41] : memref<8x128xf32, #tpu.memory_space<vmem>>, vector<8x128xf32>
      %52 = vector.shape_cast %51 : vector<8x128xf32> to vector<1x8x128xf32>
      %cst_42 = arith.constant dense<0.000000e+00> : vector<1xf32>
      %53 = vector.multi_reduction <add>, %52, %cst_42 [1, 2] : vector<1x8x128xf32> to vector<1xf32>
      %54 = vector.shape_cast %53 : vector<1xf32> to vector<1x1x1xf32>
      %55 = vector.extract %54[0, 0, 0] : f32 from vector<1x1x1xf32>
      %c0_43 = arith.constant 0 : index
      %c1 = arith.constant 1 : index
      %56 = memref.load %arg5[%c0_43, %c1] : memref<1x4xf32, #tpu.memory_space<smem>>
      memref.store %55, %arg5[%c0_43, %c1] : memref<1x4xf32, #tpu.memory_space<smem>>
      %c0_44 = arith.constant 0 : index
      %c0_45 = arith.constant 0 : index
      %57 = vector.load %arg8[%c0_44, %c0_45] : memref<8x128xf32, #tpu.memory_space<vmem>>, vector<8x128xf32>
      %58 = vector.shape_cast %57 : vector<8x128xf32> to vector<1x8x128xf32>
      %cst_46 = arith.constant dense<0.000000e+00> : vector<1xf32>
      %59 = vector.multi_reduction <add>, %58, %cst_46 [1, 2] : vector<1x8x128xf32> to vector<1xf32>
      %60 = vector.shape_cast %59 : vector<1xf32> to vector<1x1x1xf32>
      %61 = vector.extract %60[0, 0, 0] : f32 from vector<1x1x1xf32>
      %c0_47 = arith.constant 0 : index
      %c2 = arith.constant 2 : index
      %62 = memref.load %arg5[%c0_47, %c2] : memref<1x4xf32, #tpu.memory_space<smem>>
      memref.store %61, %arg5[%c0_47, %c2] : memref<1x4xf32, #tpu.memory_space<smem>>
      %c0_48 = arith.constant 0 : index
      %c0_49 = arith.constant 0 : index
      %63 = vector.load %arg9[%c0_48, %c0_49] : memref<8x128xf32, #tpu.memory_space<vmem>>, vector<8x128xf32>
      %64 = vector.shape_cast %63 : vector<8x128xf32> to vector<1x8x128xf32>
      %cst_50 = arith.constant dense<0.000000e+00> : vector<1xf32>
      %65 = vector.multi_reduction <add>, %64, %cst_50 [1, 2] : vector<1x8x128xf32> to vector<1xf32>
      %66 = vector.shape_cast %65 : vector<1xf32> to vector<1x1x1xf32>
      %67 = vector.extract %66[0, 0, 0] : f32 from vector<1x1x1xf32>
      %c0_51 = arith.constant 0 : index
      %c3 = arith.constant 3 : index
      %68 = memref.load %arg5[%c0_51, %c3] : memref<1x4xf32, #tpu.memory_space<smem>>
      memref.store %67, %arg5[%c0_51, %c3] : memref<1x4xf32, #tpu.memory_space<smem>>
    } else {
    }
    return
  }
  func.func @transform_0(%arg0: i32, %arg1: i32) -> (i32, i32) {
    %c1_i32 = arith.constant 1 : i32
    %0 = arith.muli %arg0, %c1_i32 : i32
    %1 = arith.addi %0, %arg1 : i32
    %c0_i32 = arith.constant 0 : i32
    %c0_i32_0 = arith.constant 0 : i32
    return %1, %c0_i32 : i32, i32
  }
  func.func @transform_1(%arg0: i32, %arg1: i32) -> (i32, i32) {
    %c1_i32 = arith.constant 1 : i32
    %0 = arith.muli %arg0, %c1_i32 : i32
    %1 = arith.addi %0, %arg1 : i32
    %c0_i32 = arith.constant 0 : i32
    %c0_i32_0 = arith.constant 0 : i32
    return %1, %c0_i32 : i32, i32
  }
  func.func @transform_2(%arg0: i32, %arg1: i32) -> (i32, i32) {
    %c1_i32 = arith.constant 1 : i32
    %0 = arith.muli %arg0, %c1_i32 : i32
    %1 = arith.addi %0, %arg1 : i32
    %c0_i32 = arith.constant 0 : i32
    %c0_i32_0 = arith.constant 0 : i32
    return %1, %c0_i32 : i32, i32
  }
  func.func @transform_3(%arg0: i32, %arg1: i32) -> (i32, i32) {
    %c0_i32 = arith.constant 0 : i32
    %c0_i32_0 = arith.constant 0 : i32
    return %arg0, %c0_i32 : i32, i32
  }
}

</mosaic_0001>

<bundles_post_ra>
// kernel: tpu_custom_call.1
= control target key start
LH: loop header
LB: loop body
LE: loop exit
PB: predicated region body
PF: predicated region fallthrough
CT: control target
= control target key end

     0   :  { %8 = vsyncpa [#allocation7], 0  ;;  %s314_s0 = inlined_call_operand.hbm [shape: f32[16,128], index: 0, kind: input, shape index: {}]   ;;  %s315_s1 = inlined_call_operand.hbm [shape: f32[16,128], index: 1, kind: input, shape index: {}]   ;;  %s316_s2 = inlined_call_operand.hbm [shape: f32[16,128], index: 2, kind: input, shape index: {}]   ;;  %s317_s3 = inlined_call_operand.hbm [shape: f32[1,4], index: 3, kind: output, shape index: {}]  }
   0x1   :  { %9 = vsyncpa [#allocation10], 0 }
   0x2   :  { %10 = vsyncpa [#allocation8], 0  ;;  %s275_s12 = smov [#allocation9]   ;;  %s276_s14 = smov [#allocation6]  }
   0x3   :  { %s36_s13 = sshll.u32 %s275_s12, 4  ;;  %s20_s15 = sshll.u32 %s276_s14, 4  ;;  %s37_s13 = int_to_ptr.vmem [resolvable:$true] %s36_s13  ;;  %s21_s15 = int_to_ptr.vmem [resolvable:$true] %s20_s15 }
   0x4   :  { %s209_s16 = scalar_lea.vmem %s37_s13, 256  ;;  %p214_p1 = scmp.lt.s32.totalorder %s37_s13, %s37_s13 }
   0x5   :  { %p210_p0 = scmp.ne.s32.totalorder %s37_s13, %s209_s16  ;;  %p215_p2 = scmp.lt.s32.totalorder %s209_s16, %s209_s16 }
   0x7   :  { %p216_p3 = por %p215_p2, %p214_p1 }
   0x9   :  { %p217_p4 = pnand %p216_p3, %p210_p0 }
   0xb   :  { %220 = shalt.err (!%p217_p4)
}
   0xc   :  { %s277_s17 = smov 128   ;;  %s278_s18 = smov 8  }
   0xd   :  { %42 = dma.hbm_to_vmem [thread:$0]  %s315_s1, 256, %s37_s13, [#allocation10], %s277_s17, %s277_s17, %s278_s18  }
   0xe   :  { %s229_s21 = scalar_lea.vmem %s21_s15, 256  ;;  %p234_p6 = scmp.lt.s32.totalorder %s21_s15, %s21_s15 }
   0xf   :  { %p230_p5 = scmp.ne.s32.totalorder %s21_s15, %s229_s21  ;;  %p235_p7 = scmp.lt.s32.totalorder %s229_s21, %s229_s21 }
  0x11   :  { %p236_p8 = por %p235_p7, %p234_p6 }
  0x13   :  { %p237_p9 = pnand %p236_p8, %p230_p5 }
  0x15   :  { %240 = shalt.err (!%p237_p9)
}
  0x16   :  { %26 = dma.hbm_to_vmem [thread:$0]  %s314_s0, 256, %s21_s15, [#allocation7], %s277_s17, %s277_s17, %s278_s18  }
  0x17   :  { %s279_s24 = smov [#allocation11]  }
  0x18   :  { %s52_s25 = sshll.u32 %s279_s24, 4  ;;  %s53_s25 = int_to_ptr.vmem [resolvable:$true] %s52_s25 }
  0x19   :  { %s249_s26 = scalar_lea.vmem %s53_s25, 256  ;;  %p254_p11 = scmp.lt.s32.totalorder %s53_s25, %s53_s25 }
  0x1a   :  { %p250_p10 = scmp.ne.s32.totalorder %s53_s25, %s249_s26  ;;  %p255_p12 = scmp.lt.s32.totalorder %s249_s26, %s249_s26 }
  0x1c   :  { %p256_p13 = por %p255_p12, %p254_p11 }
  0x1e   :  { %p257_p0 = pnand %p256_p13, %p250_p10 }
  0x20   :  { %260 = shalt.err (!%p257_p0)
}
  0x21   :  { %58 = dma.hbm_to_vmem [thread:$0]  %s316_s2, 256, %s53_s25, [#allocation10], %s277_s17, %s277_s17, %s278_s18  }
  0x22   :  { %269 = dma.done.wait [#allocation7], 256  }
  0x23   :  { %270 = vsyncadd [#allocation7], 4294967040 }
  0x24   :  { %271 = dma.done.wait [#allocation10], 512  }
  0x25   :  { %272 = vsyncadd [#allocation10], 4294966784  ;;  %v82_v0 = vld [vmem:[#allocation6] sm:$0xff]  ;;  %v83_v1 = vld [vmem:[#allocation6 + $0x8] sm:$0xff]  ;;  %v280_v12 = vmov 0.0   ;;  %s281_s30 = smov [#allocation12]  }
  0x26   :  { %v84_v2 = vld [vmem:[#allocation9] sm:$0xff]  ;;  %v85_v3 = vld [vmem:[#allocation9 + $0x8] sm:$0xff]  ;;  %v86_v4 = vld [vmem:[#allocation11] sm:$0xff] }
  0x27   :  { %v87_v5 = vld [vmem:[#allocation11 + $0x8] sm:$0xff]  ;;  %v92_v6 = vsub.f32 %v82_v0, %v84_v2  ;;  %vm90_vm0 = vcmp.ne.f32.partialorder %v86_v4, 1.0  ;;  %v93_v7 = vsub.f32 %v83_v1, %v85_v3  ;;  %vm88_vm1 = vcmp.ne.f32.partialorder %v86_v4, 0.0 }
  0x28   :  { %vm91_vm2 = vcmp.ne.f32.partialorder %v87_v5, 1.0  ;;  %vm89_vm3 = vcmp.ne.f32.partialorder %v87_v5, 0.0  ;;  %v115_v13 = vsel %vm90_vm0, 1.0, %v280_v12  ;;  %v103_v17 = vsel %vm88_vm1, 1.0, %v280_v12 }
  0x29   :  { %v94_v8 = vmul.f32 %v92_v6, %v92_v6  ;;  %v95_v9 = vmul.f32 %v93_v7, %v93_v7  ;;  %v116_v14 = vsel %vm91_vm2, 1.0, %v280_v12  ;;  %v104_v18 = vsel %vm89_vm3, 1.0, %v280_v12 }
  0x2a   :  { %v117_v21 = vadd.f32 %v116_v14, %v115_v13  ;;  %v105_v22 = vadd.f32 %v104_v18, %v103_v17 }
  0x2b   :  { %v109_v10 = vsel %vm90_vm0, %v94_v8, 0.0  ;;  %v97_v11 = vsel %vm88_vm1, %v94_v8, 0.0  ;;  %v110_v15 = vsel %vm91_vm2, %v95_v9, 0.0  ;;  %v98_v16 = vsel %vm89_vm3, %v95_v9, 0.0 }
  0x2c   :  { %v111_v19 = vadd.f32 %v110_v15, %v109_v10  ;;  %v99_v20 = vadd.f32 %v98_v16, %v97_v11 }
  0x2e   :  { %148 = vadd.xlane.f32.xlu1 %v111_v19  ;;  %124 = vadd.xlane.f32.xlu0 %v99_v20 }
  0x32   :  { %160 = vadd.xlane.f32.xlu1 %v117_v21  ;;  %136 = vadd.xlane.f32.xlu0 %v105_v22 }
  0xb7   :  { %v149_v23 = vpop.xlane.xlu1 %148  ;;  %v125_v24 = vpop.xlane.xlu0 %124 }
  0xb8   :  { %v150_v25 = vrot.slane %v149_v23, 4  ;;  %v126_v26 = vrot.slane %v125_v24, 4 }
  0xba   :  { %v151_v27 = vadd.f32 %v150_v25, %v149_v23  ;;  %v127_v28 = vadd.f32 %v126_v26, %v125_v24 }
  0xbb   :  { %v161_v29 = vpop.xlane.xlu1 %160  ;;  %v137_v30 = vpop.xlane.xlu0 %136 }
  0xbc   :  { %v152_v31 = vrot.slane %v151_v27, 2  ;;  %v128_v32 = vrot.slane %v127_v28, 2  ;;  %v162_v33 = vrot.slane %v161_v29, 4  ;;  %v138_v34 = vrot.slane %v137_v30, 4 }
  0xbe   :  { %v163_v35 = vadd.f32 %v162_v33, %v161_v29  ;;  %v139_v36 = vadd.f32 %v138_v34, %v137_v30  ;;  %v129_v37 = vadd.f32 %v128_v32, %v127_v28  ;;  %v153_v38 = vadd.f32 %v152_v31, %v151_v27 }
  0xc0   :  { %v164_v39 = vrot.slane %v163_v35, 2  ;;  %v140_v40 = vrot.slane %v139_v36, 2  ;;  %v130_v41 = vrot.slane %v129_v37, 1  ;;  %v154_v45 = vrot.slane %v153_v38, 1 }
  0xc2   :  { %v165_v42 = vadd.f32 %v164_v39, %v163_v35  ;;  %v141_v43 = vadd.f32 %v140_v40, %v139_v36  ;;  %v131_v44 = vadd.f32 %v130_v41, %v129_v37  ;;  %v155_v50 = vadd.f32 %v154_v45, %v153_v38 }
  0xc4   :  { %186 = vpush %v131_v44  ;;  %v142_v46 = vrot.slane %v141_v43, 1  ;;  %v166_v47 = vrot.slane %v165_v42, 1 }
  0xc6   :  { %v143_v48 = vadd.f32 %v142_v46, %v141_v43  ;;  %v167_v49 = vadd.f32 %v166_v47, %v165_v42 }
  0xc8   :  { %188 = vpush %v143_v48 }
  0xc9   :  { %190 = vpush %v155_v50 }
  0xca   :  { %192 = vpush %v167_v49 }
  0xf5   :  { %s187_s0 = spop %186 }
  0xf6   :  { %134 = sst [smem:[#allocation12]] %s187_s0 }
  0xf9   :  { %s189_s2 = spop %188 }
  0xfa   :  { %146 = sst [smem:[#allocation12 + $0x1]] %s189_s2  ;;  %s191_s28 = spop %190 }
  0xfb   :  { %158 = sst [smem:[#allocation12 + $0x2]] %s191_s28  ;;  %s193_s29 = spop %192 }
  0xfc   :  { %170 = sst [smem:[#allocation12 + $0x3]] %s193_s29 }
  0xfd   :  { %178 = dma.smem_to_hbm %s281_s30, 16, %s317_s3, [#allocation8]  }
  0xfe   :  { %273 = dma.done.wait [#allocation8], 16  }
  0xff   :  { %274 = vsyncadd [#allocation8], 4294967280 }
 0x100   :  { %182 = sfence }
 0x101   :  { %183 = vsyncpa [#allocation7], 1 }
 0x102   :  { %184 = vsyncpa [#allocation10], 1 }
 0x103   :  { %185 = vsyncpa [#allocation8], 1 }

</bundles_post_ra>
